<compile_context>
chip_gen: v5e
topology: v5e:2x2
jax: 0.10.0
libtpu: 0.0.40
codegen_flags: <defaults>
</compile_context>

<pallas_src>
import functools

import jax
import jax.numpy as jnp
from jax.experimental import pallas as pl
from jax.experimental.pallas import tpu as pltpu

_MIB = 1024 * 1024


def _autoencoder_kernel(x_ref, we_ref, be_ref, wd_ref, bd_ref,
                        out_ref, hsum_ref, *, batch_size, precision=None):
    """One batch tile: decoded tile + per-tile column-sum of the hidden layer."""
    tb = x_ref.shape[0]
    n_hidden = we_ref.shape[1]

    # Encoder: sigmoid(x @ W_enc^T + b_enc).  The wrapper pre-transposed the
    # weights so both matmuls contract against the RHS's leading dim (MXU-native
    # orientation) -- no per-tile relayout of the grid-invariant weight blocks.
    # f32 accumulation on the MXU.
    h = jax.lax.dot_general(
        x_ref[...], we_ref[...], (((1,), (0,)), ((), ())),
        precision=precision, preferred_element_type=jnp.float32)
    h = jax.nn.sigmoid(h + be_ref[...])          # bias-add + sigmoid kept in f32

    # Decoder: h @ W_dec^T + b_dec (h cast to the weight dtype -> bf16 MXU path
    # when the wrapper requests it).  f32 accumulation.
    dec = jax.lax.dot_general(
        h.astype(wd_ref.dtype), wd_ref[...], (((1,), (0,)), ((), ())),
        precision=precision, preferred_element_type=jnp.float32)
    out_ref[...] = (dec + bd_ref[...]).astype(out_ref.dtype)

    # Per-tile column sum of hidden activations.  The KL term is nonlinear, so
    # the batch mean must be completed over ALL tiles before the log; we emit
    # partial sums and finish the O(n_hidden) KL in the wrapper.  This keeps
    # the batch grid axis "parallel".
    if batch_size % tb != 0:
        # Last tile is partial: mask out the padded (out-of-range) rows.
        row = (jax.lax.broadcasted_iota(jnp.int32, (tb, 1), 0)
               + pl.program_id(0) * tb)
        h = jnp.where(row < batch_size, h, 0.0)
    # (Perf review: an (nb, 8, n_hidden) partial sum would avoid the full
    #  sublane collapse / sublane-1 store; deferred as explicitly low priority
    #  unless a bundle dump shows XLU or store-slot pressure.)
    hsum_ref[...] = jnp.sum(h, axis=0, keepdims=True).reshape(1, 1, n_hidden)


def _vmem_budget_bytes():
    """Generation-aware VMEM budget: (picker budget, scoped vmem limit)."""
    cap = 64 * _MIB                      # smallest-VMEM chip (v7x per-TC) fallback
    try:
        info = pltpu.get_tpu_info()
        cap = int(getattr(info, "vmem_capacity_bytes", cap))
    except Exception:
        pass
    # Leave ~24 MiB headroom for compiler scratch below the scoped limit.
    budget = max(16 * _MIB, cap - 24 * _MIB)          # 104 MiB on v5e/v6e, 40 MiB on v7x
    limit = min(cap, max(budget + 8 * _MIB, cap - 8 * _MIB))
    return budget, limit


def _pick_batch_tile(batch, n_in, n_hidden, in_bytes, out_bytes, budget_bytes):
    """Largest batch tile whose pipelined VMEM footprint fits the budget.

    Weights/biases are grid-invariant and single-buffered; the x / decoded
    tiles are double-buffered by the pipeline.  Candidates prefer multiples of
    256 (MXU native M on v6e/v7x, also a multiple of v5e's 128); the 16-row
    sublane quantum is only the small-batch fallback.
    """
    w_bytes = (n_in * n_hidden * in_bytes * 2          # W_enc^T + W_dec^T, single-buffered
               + (n_in + n_hidden) * 4)                # f32 biases
    tb = 16
    for cand in (2048, 1024, 512, 256, 128, 64, 32, 16):
        tile_bytes = (2 * cand * n_in * in_bytes       # x tile, double-buffered
                      + 2 * cand * n_in * out_bytes    # decoded tile, double-buffered
                      + 2 * cand * n_hidden * 4        # f32 hidden intermediate + slack
                      + 2 * 8 * n_hidden * 4)          # hidden col-sum output tile
        if w_bytes + tile_bytes <= budget_bytes:
            tb = cand
            break
    # TODO(synk): if the weight matrices alone approach the budget (very large
    # n_in * n_hidden, most likely on v7x's 64 MiB VMEM), add a feature-dim
    # "arbitrary" grid axis with an f32 accumulator scratch (tiled-matmul
    # pattern) instead of only shrinking the batch tile.
    tb = min(tb, ((batch + 15) // 16) * 16)
    # v7x megacore: with dimension_semantics=("parallel",) both TensorCores only
    # get work if there are >= 2 grid steps.  Split large single-tile batches.
    if tb >= batch and batch >= 512:
        tb = (((batch + 1) // 2 + 15) // 16) * 16
    return max(16, tb)


def autoencoder_forward(x, w_enc, b_enc, w_dec, b_dec, sparsity_target=0.05,
                        *, use_bf16_matmul=False, out_dtype=None,
                        matmul_precision=None, block_b=None):
    """x: [B, n_in]; w_enc: [n_hidden, n_in]; b_enc: [n_hidden];
    w_dec: [n_in, n_hidden]; b_dec: [n_in]  (PyTorch nn.Linear conventions).

    Returns (decoded [B, n_in], sparsity_loss scalar f32).

    use_bf16_matmul: bf16 MXU operands with f32 accumulation -- halves x/weight
      HBM traffic and runs at full MXU rate on every generation (v5e/v6e/v7x
      are all bf16-native on the MXU; bias-add/sigmoid stay in f32).
    out_dtype: decoded output dtype (default f32); pass jnp.bfloat16 together
      with the bf16 path to also halve the dominant decoded HBM write stream.
    matmul_precision: optional lax precision knob (e.g. 'highest') to match a
      torch float32 reference bit-for-bit on the f32 path.
    """
    B, n_in = x.shape
    n_hidden = w_enc.shape[0]

    mm_dtype = jnp.bfloat16 if use_bf16_matmul else jnp.float32
    x_in = x.astype(mm_dtype)
    # One-time wrapper transposes put the contraction on the RHS's leading dim
    # (MXU-native layout); layout plumbing paid once per call, not per tile.
    we = jnp.transpose(w_enc).astype(mm_dtype)      # [n_in, n_hidden]
    wd = jnp.transpose(w_dec).astype(mm_dtype)      # [n_hidden, n_in]
    be = b_enc.astype(jnp.float32).reshape(1, n_hidden)
    bd = b_dec.astype(jnp.float32).reshape(1, n_in)

    out_dtype = jnp.dtype(jnp.float32 if out_dtype is None else out_dtype)

    budget_bytes, vmem_limit = _vmem_budget_bytes()
    if block_b is None:
        block_b = _pick_batch_tile(B, n_in, n_hidden, x_in.dtype.itemsize,
                                   out_dtype.itemsize, budget_bytes)
    block_b = max(16, ((block_b + 15) // 16) * 16)   # sublane-aligned (f32 & bf16 packing)
    nb = pl.cdiv(B, block_b)

    kernel = functools.partial(_autoencoder_kernel, batch_size=B,
                               precision=matmul_precision)

    cost = pl.CostEstimate(
        flops=4 * B * n_in * n_hidden,               # encoder + decoder matmuls
        transcendentals=B * n_hidden,                # sigmoid
        bytes_accessed=(x_in.size * x_in.dtype.itemsize
                        + we.size * we.dtype.itemsize
                        + wd.size * wd.dtype.itemsize
                        + (be.size + bd.size) * 4
                        + B * n_in * out_dtype.itemsize
                        + nb * n_hidden * 4))

    out_shape = (
        jax.ShapeDtypeStruct((B, n_in), out_dtype),
        jax.ShapeDtypeStruct((nb, 1, n_hidden), jnp.float32),
    )
    out_specs = (
        pl.BlockSpec((block_b, n_in), lambda i: (i, 0)),      # decoded tile
        pl.BlockSpec((1, 1, n_hidden), lambda i: (i, 0, 0)),  # per-tile hidden col-sum
    )
    x_spec = pl.BlockSpec((block_b, n_in), lambda i: (i, 0))  # x tile (pipelined)

    def _weight_specs(pipeline_mode):
        kw = {} if pipeline_mode is None else {"pipeline_mode": pipeline_mode}
        return [
            pl.BlockSpec((n_in, n_hidden), lambda i: (0, 0), **kw),   # W_enc^T
            pl.BlockSpec((1, n_hidden), lambda i: (0, 0), **kw),      # b_enc
            pl.BlockSpec((n_hidden, n_in), lambda i: (0, 0), **kw),   # W_dec^T
            pl.BlockSpec((1, n_in), lambda i: (0, 0), **kw),          # b_dec
        ]

    def _call(pipeline_mode):
        return pl.pallas_call(
            kernel,
            out_shape=out_shape,
            grid=(nb,),
            in_specs=[x_spec] + _weight_specs(pipeline_mode),
            out_specs=out_specs,
            compiler_params=pltpu.CompilerParams(
                dimension_semantics=("parallel",),
                vmem_limit_bytes=int(vmem_limit),
            ),
            cost_estimate=cost,
        )(x_in, we, be, wd, bd)

    try:
        # Grid-invariant weights/biases: single VMEM buffer (their block index
        # never moves, so the default double buffer is pure VMEM waste).
        decoded, h_sums = _call(pl.Buffered(1))
    except Exception:
        # Fallback if this JAX/Mosaic build rejects 1-deep pipelining.
        decoded, h_sums = _call(None)

    # Finish the sparsity (KL) loss in plain JAX: O(n_hidden) work; doing it
    # here lets the kernel's batch grid axis stay "parallel".
    q = jnp.sum(h_sums[:, 0, :].astype(jnp.float32), axis=0) / B
    eps = jnp.float32(1e-7)
    q = jnp.clip(q, eps, 1.0 - eps)          # guard dead / saturated hidden units
    p = jnp.float32(sparsity_target)
    sparsity_loss = jnp.sum(p * jnp.log(p / q)
                            + (1.0 - p) * jnp.log((1.0 - p) / (1.0 - q)))
    return decoded, sparsity_loss


if __name__ == "__main__":
    # Small shapes consistent with Autoencoder(n_in, n_hidden).
    B, n_in, n_hidden = 64, 32, 16
    sparsity_target = 0.05

    key = jax.random.PRNGKey(0)
    k_x, k_we, k_be, k_wd, k_bd = jax.random.split(key, 5)

    x = jax.random.uniform(k_x, (B, n_in), jnp.float32)          # inputs in (0,1)
    lim_e = 1.0 / jnp.sqrt(n_in)
    lim_d = 1.0 / jnp.sqrt(n_hidden)
    w_enc = jax.random.uniform(k_we, (n_hidden, n_in), jnp.float32, -lim_e, lim_e)
    b_enc = jax.random.uniform(k_be, (n_hidden,), jnp.float32, -lim_e, lim_e)
    w_dec = jax.random.uniform(k_wd, (n_in, n_hidden), jnp.float32, -lim_d, lim_d)
    b_dec = jax.random.uniform(k_bd, (n_in,), jnp.float32, -lim_d, lim_d)

    def reference(xr):
        h = jax.nn.sigmoid(jnp.dot(xr, w_enc.T, precision="highest") + b_enc)
        dec = jnp.dot(h, w_dec.T, precision="highest") + b_dec
        q = jnp.mean(h, axis=0)
        p = sparsity_target
        sl = jnp.sum(p * jnp.log(p / q) + (1 - p) * jnp.log((1 - p) / (1 - q)))
        return dec, sl

    dec_ref, sl_ref = reference(x)

    # 1) f32 path, multi-tile batch grid (block_b=16 -> 4 pipelined grid steps).
    dec, sl = autoencoder_forward(x, w_enc, b_enc, w_dec, b_dec,
                                  sparsity_target, block_b=16)
    jax.block_until_ready((dec, sl))
    assert jnp.allclose(dec, dec_ref, atol=1e-2, rtol=1e-2), "decoded mismatch (f32)"
    assert jnp.allclose(sl, sl_ref, atol=5e-2, rtol=5e-2), "loss mismatch (f32)"

    # 2) Uneven batch (last tile partial) -> exercises the row-masking path.
    xu = x[:52]
    dec_u, sl_u = autoencoder_forward(xu, w_enc, b_enc, w_dec, b_dec,
                                      sparsity_target, block_b=16)
    jax.block_until_ready((dec_u, sl_u))
    dec_ref_u, sl_ref_u = reference(xu)
    assert jnp.allclose(dec_u, dec_ref_u, atol=1e-2, rtol=1e-2), "decoded mismatch (uneven B)"
    assert jnp.allclose(sl_u, sl_ref_u, atol=5e-2, rtol=5e-2), "loss mismatch (uneven B)"

    # 3) bf16 MXU operands (f32 accumulation), auto tile pick -- fast path on
    #    v5e/v6e/v7x alike.
    dec_b, sl_b = autoencoder_forward(x, w_enc, b_enc, w_dec, b_dec,
                                      sparsity_target, use_bf16_matmul=True)
    jax.block_until_ready((dec_b, sl_b))
    assert jnp.allclose(dec_b, dec_ref, atol=5e-2, rtol=5e-2), "decoded mismatch (bf16)"
    assert jnp.allclose(sl_b, sl_ref, atol=2e-1, rtol=1e-1), "loss mismatch (bf16)"

    # 4) bf16 decoded output as well (cuts the dominant HBM write stream).
    dec_bo, sl_bo = autoencoder_forward(x, w_enc, b_enc, w_dec, b_dec,
                                        sparsity_target, use_bf16_matmul=True,
                                        out_dtype=jnp.bfloat16)
    jax.block_until_ready((dec_bo, sl_bo))
    assert jnp.allclose(dec_bo.astype(jnp.float32), dec_ref,
                        atol=1e-1, rtol=1e-1), "decoded mismatch (bf16 out)"

    print("KERNEL_OK")
</pallas_src>

<mosaic_0001>
module attributes {stable_mosaic.version = 11 : i64} {
  func.func @_autoencoder_kernel(%arg0: i32, %arg1: memref<16x32xf32, #tpu.memory_space<vmem>>, %arg2: memref<32x16xf32, #tpu.memory_space<vmem>>, %arg3: memref<1x16xf32, #tpu.memory_space<vmem>>, %arg4: memref<16x32xf32, #tpu.memory_space<vmem>>, %arg5: memref<1x32xf32, #tpu.memory_space<vmem>>, %arg6: memref<16x32xf32, #tpu.memory_space<vmem>>, %arg7: memref<1x1x16xf32, #tpu.memory_space<vmem>>) attributes {dimension_semantics = [#tpu.dimension_semantics<parallel>], iteration_bounds = array<i64: 4>, scalar_prefetch = 0 : i64, scratch_operands = 0 : i64, tpu.core_type = #tpu.core_type<tc>, window_params = [{transform_indices = @transform_0, window_bounds = array<i64: 16, 32>}, {pipeline_mode = #tpu.pipeline_mode<synchronous>, transform_indices = @transform_1, window_bounds = array<i64: 32, 16>}, {pipeline_mode = #tpu.pipeline_mode<synchronous>, transform_indices = @transform_2, window_bounds = array<i64: 1, 16>}, {pipeline_mode = #tpu.pipeline_mode<synchronous>, transform_indices = @transform_3, window_bounds = array<i64: 16, 32>}, {pipeline_mode = #tpu.pipeline_mode<synchronous>, transform_indices = @transform_4, window_bounds = array<i64: 1, 32>}, {transform_indices = @transform_5, window_bounds = array<i64: 16, 32>}, {transform_indices = @transform_6, window_bounds = array<i64: 1, 1, 16>}]} {
    %c0 = arith.constant 0 : index
    %c0_0 = arith.constant 0 : index
    %0 = vector.load %arg1[%c0, %c0_0] : memref<16x32xf32, #tpu.memory_space<vmem>>, vector<16x32xf32>
    %c0_1 = arith.constant 0 : index
    %c0_2 = arith.constant 0 : index
    %1 = vector.load %arg2[%c0_1, %c0_2] : memref<32x16xf32, #tpu.memory_space<vmem>>, vector<32x16xf32>
    %cst = arith.constant dense<0.000000e+00> : vector<16x16xf32>
    %2 = tpu.matmul %0, %1, %cst {dimension_numbers = #tpu.dot_dimension_numbers<[1], [0], [0], [1], [0, 0, 1, 1], [], []>} : vector<16x32xf32>, vector<32x16xf32>, vector<16x16xf32> -> vector<16x16xf32>
    %c0_3 = arith.constant 0 : index
    %c0_4 = arith.constant 0 : index
    %3 = vector.load %arg3[%c0_3, %c0_4] : memref<1x16xf32, #tpu.memory_space<vmem>>, vector<1x16xf32>
    %4 = vector.broadcast %3 : vector<1x16xf32> to vector<16x16xf32>
    %5 = arith.addf %2, %4 : vector<16x16xf32>
    %6 = arith.negf %5 : vector<16x16xf32>
    %7 = math.exp %6 : vector<16x16xf32>
    %cst_5 = arith.constant 1.000000e+00 : f32
    %8 = vector.broadcast %cst_5 : f32 to vector<16x16xf32>
    %9 = arith.addf %8, %7 : vector<16x16xf32>
    %10 = arith.divf %8, %9 : vector<16x16xf32>
    %c0_6 = arith.constant 0 : index
    %c0_7 = arith.constant 0 : index
    %11 = vector.load %arg4[%c0_6, %c0_7] : memref<16x32xf32, #tpu.memory_space<vmem>>, vector<16x32xf32>
    %cst_8 = arith.constant dense<0.000000e+00> : vector<16x32xf32>
    %12 = tpu.matmul %10, %11, %cst_8 {dimension_numbers = #tpu.dot_dimension_numbers<[1], [0], [0], [1], [0, 0, 1, 1], [], []>} : vector<16x16xf32>, vector<16x32xf32>, vector<16x32xf32> -> vector<16x32xf32>
    %c0_9 = arith.constant 0 : index
    %c0_10 = arith.constant 0 : index
    %13 = vector.load %arg5[%c0_9, %c0_10] : memref<1x32xf32, #tpu.memory_space<vmem>>, vector<1x32xf32>
    %14 = vector.broadcast %13 : vector<1x32xf32> to vector<16x32xf32>
    %15 = arith.addf %12, %14 : vector<16x32xf32>
    %c0_11 = arith.constant 0 : index
    %c0_12 = arith.constant 0 : index
    %16 = vector.load %arg6[%c0_11, %c0_12] : memref<16x32xf32, #tpu.memory_space<vmem>>, vector<16x32xf32>
    tpu.vector_store %arg6[%c0_11, %c0_12], %15 {strides = array<i32>} : memref<16x32xf32, #tpu.memory_space<vmem>>, vector<16x32xf32>,
    %cst_13 = arith.constant dense<0.000000e+00> : vector<16xf32>
    %17 = vector.multi_reduction <add>, %10, %cst_13 [0] : vector<16x16xf32> to vector<16xf32>
    %18 = vector.shape_cast %17 : vector<16xf32> to vector<1x16xf32>
    %19 = vector.shape_cast %18 : vector<1x16xf32> to vector<1x1x16xf32>
    %c0_14 = arith.constant 0 : index
    %c0_15 = arith.constant 0 : index
    %c0_16 = arith.constant 0 : index
    %20 = vector.load %arg7[%c0_14, %c0_15, %c0_16] : memref<1x1x16xf32, #tpu.memory_space<vmem>>, vector<1x1x16xf32>
    tpu.vector_store %arg7[%c0_14, %c0_15, %c0_16], %19 {strides = array<i32>} : memref<1x1x16xf32, #tpu.memory_space<vmem>>, vector<1x1x16xf32>,
    return
  }
  func.func @transform_0(%arg0: i32) -> (i32, i32) {
    %c0_i32 = arith.constant 0 : i32
    %c0_i32_0 = arith.constant 0 : i32
    return %arg0, %c0_i32 : i32, i32
  }
  func.func @transform_1(%arg0: i32) -> (i32, i32) {
    %c0_i32 = arith.constant 0 : i32
    %c0_i32_0 = arith.constant 0 : i32
    %c0_i32_1 = arith.constant 0 : i32
    return %c0_i32, %c0_i32_0 : i32, i32
  }
  func.func @transform_2(%arg0: i32) -> (i32, i32) {
    %c0_i32 = arith.constant 0 : i32
    %c0_i32_0 = arith.constant 0 : i32
    %c0_i32_1 = arith.constant 0 : i32
    return %c0_i32, %c0_i32_0 : i32, i32
  }
  func.func @transform_3(%arg0: i32) -> (i32, i32) {
    %c0_i32 = arith.constant 0 : i32
    %c0_i32_0 = arith.constant 0 : i32
    %c0_i32_1 = arith.constant 0 : i32
    return %c0_i32, %c0_i32_0 : i32, i32
  }
  func.func @transform_4(%arg0: i32) -> (i32, i32) {
    %c0_i32 = arith.constant 0 : i32
    %c0_i32_0 = arith.constant 0 : i32
    %c0_i32_1 = arith.constant 0 : i32
    return %c0_i32, %c0_i32_0 : i32, i32
  }
  func.func @transform_5(%arg0: i32) -> (i32, i32) {
    %c0_i32 = arith.constant 0 : i32
    %c0_i32_0 = arith.constant 0 : i32
    return %arg0, %c0_i32 : i32, i32
  }
  func.func @transform_6(%arg0: i32) -> (i32, i32, i32) {
    %c0_i32 = arith.constant 0 : i32
    %c0_i32_0 = arith.constant 0 : i32
    %c0_i32_1 = arith.constant 0 : i32
    return %arg0, %c0_i32, %c0_i32_0 : i32, i32, i32
  }
}

module attributes {stable_mosaic.version = 11 : i64} {
  func.func @_autoencoder_kernel(%arg0: i32, %arg1: memref<16x32xf32, #tpu.memory_space<vmem>>, %arg2: memref<32x16xf32, #tpu.memory_space<vmem>>, %arg3: memref<1x16xf32, #tpu.memory_space<vmem>>, %arg4: memref<16x32xf32, #tpu.memory_space<vmem>>, %arg5: memref<1x32xf32, #tpu.memory_space<vmem>>, %arg6: memref<16x32xf32, #tpu.memory_space<vmem>>, %arg7: memref<1x1x16xf32, #tpu.memory_space<vmem>>) attributes {dimension_semantics = [#tpu.dimension_semantics<parallel>], iteration_bounds = array<i64: 4>, scalar_prefetch = 0 : i64, scratch_operands = 0 : i64, tpu.core_type = #tpu.core_type<tc>, window_params = [{transform_indices = @transform_0, window_bounds = array<i64: 16, 32>}, {pipeline_mode = #tpu.pipeline_mode<synchronous>, transform_indices = @transform_1, window_bounds = array<i64: 32, 16>}, {pipeline_mode = #tpu.pipeline_mode<synchronous>, transform_indices = @transform_2, window_bounds = array<i64: 1, 16>}, {pipeline_mode = #tpu.pipeline_mode<synchronous>, transform_indices = @transform_3, window_bounds = array<i64: 16, 32>}, {pipeline_mode = #tpu.pipeline_mode<synchronous>, transform_indices = @transform_4, window_bounds = array<i64: 1, 32>}, {transform_indices = @transform_5, window_bounds = array<i64: 16, 32>}, {transform_indices = @transform_6, window_bounds = array<i64: 1, 1, 16>}]} {
    %c0 = arith.constant 0 : index
    %c0_0 = arith.constant 0 : index
    %0 = vector.load %arg1[%c0, %c0_0] : memref<16x32xf32, #tpu.memory_space<vmem>>, vector<16x32xf32>
    %c0_1 = arith.constant 0 : index
    %c0_2 = arith.constant 0 : index
    %1 = vector.load %arg2[%c0_1, %c0_2] : memref<32x16xf32, #tpu.memory_space<vmem>>, vector<32x16xf32>
    %cst = arith.constant dense<0.000000e+00> : vector<16x16xf32>
    %2 = tpu.matmul %0, %1, %cst {dimension_numbers = #tpu.dot_dimension_numbers<[1], [0], [0], [1], [0, 0, 1, 1], [], []>} : vector<16x32xf32>, vector<32x16xf32>, vector<16x16xf32> -> vector<16x16xf32>
    %c0_3 = arith.constant 0 : index
    %c0_4 = arith.constant 0 : index
    %3 = vector.load %arg3[%c0_3, %c0_4] : memref<1x16xf32, #tpu.memory_space<vmem>>, vector<1x16xf32>
    %4 = vector.broadcast %3 : vector<1x16xf32> to vector<16x16xf32>
    %5 = arith.addf %2, %4 : vector<16x16xf32>
    %6 = arith.negf %5 : vector<16x16xf32>
    %7 = math.exp %6 : vector<16x16xf32>
    %cst_5 = arith.constant 1.000000e+00 : f32
    %8 = vector.broadcast %cst_5 : f32 to vector<16x16xf32>
    %9 = arith.addf %8, %7 : vector<16x16xf32>
    %10 = arith.divf %8, %9 : vector<16x16xf32>
    %c0_6 = arith.constant 0 : index
    %c0_7 = arith.constant 0 : index
    %11 = vector.load %arg4[%c0_6, %c0_7] : memref<16x32xf32, #tpu.memory_space<vmem>>, vector<16x32xf32>
    %cst_8 = arith.constant dense<0.000000e+00> : vector<16x32xf32>
    %12 = tpu.matmul %10, %11, %cst_8 {dimension_numbers = #tpu.dot_dimension_numbers<[1], [0], [0], [1], [0, 0, 1, 1], [], []>} : vector<16x16xf32>, vector<16x32xf32>, vector<16x32xf32> -> vector<16x32xf32>
    %c0_9 = arith.constant 0 : index
    %c0_10 = arith.constant 0 : index
    %13 = vector.load %arg5[%c0_9, %c0_10] : memref<1x32xf32, #tpu.memory_space<vmem>>, vector<1x32xf32>
    %14 = vector.broadcast %13 : vector<1x32xf32> to vector<16x32xf32>
    %15 = arith.addf %12, %14 : vector<16x32xf32>
    %c0_11 = arith.constant 0 : index
    %c0_12 = arith.constant 0 : index
    %16 = vector.load %arg6[%c0_11, %c0_12] : memref<16x32xf32, #tpu.memory_space<vmem>>, vector<16x32xf32>
    tpu.vector_store %arg6[%c0_11, %c0_12], %15 {strides = array<i32>} : memref<16x32xf32, #tpu.memory_space<vmem>>, vector<16x32xf32>,
    %cst_13 = arith.constant dense<0.000000e+00> : vector<16xf32>
    %17 = vector.multi_reduction <add>, %10, %cst_13 [0] : vector<16x16xf32> to vector<16xf32>
    %18 = vector.shape_cast %17 : vector<16xf32> to vector<1x16xf32>
    %19 = vector.shape_cast %18 : vector<1x16xf32> to vector<1x1x16xf32>
    %c0_14 = arith.constant 0 : index
    %c0_15 = arith.constant 0 : index
    %c0_16 = arith.constant 0 : index
    %20 = vector.load %arg7[%c0_14, %c0_15, %c0_16] : memref<1x1x16xf32, #tpu.memory_space<vmem>>, vector<1x1x16xf32>
    tpu.vector_store %arg7[%c0_14, %c0_15, %c0_16], %19 {strides = array<i32>} : memref<1x1x16xf32, #tpu.memory_space<vmem>>, vector<1x1x16xf32>,
    return
  }
  func.func @transform_0(%arg0: i32) -> (i32, i32) {
    %c0_i32 = arith.constant 0 : i32
    %c0_i32_0 = arith.constant 0 : i32
    return %arg0, %c0_i32 : i32, i32
  }
  func.func @transform_1(%arg0: i32) -> (i32, i32) {
    %c0_i32 = arith.constant 0 : i32
    %c0_i32_0 = arith.constant 0 : i32
    %c0_i32_1 = arith.constant 0 : i32
    return %c0_i32, %c0_i32_0 : i32, i32
  }
  func.func @transform_2(%arg0: i32) -> (i32, i32) {
    %c0_i32 = arith.constant 0 : i32
    %c0_i32_0 = arith.constant 0 : i32
    %c0_i32_1 = arith.constant 0 : i32
    return %c0_i32, %c0_i32_0 : i32, i32
  }
  func.func @transform_3(%arg0: i32) -> (i32, i32) {
    %c0_i32 = arith.constant 0 : i32
    %c0_i32_0 = arith.constant 0 : i32
    %c0_i32_1 = arith.constant 0 : i32
    return %c0_i32, %c0_i32_0 : i32, i32
  }
  func.func @transform_4(%arg0: i32) -> (i32, i32) {
    %c0_i32 = arith.constant 0 : i32
    %c0_i32_0 = arith.constant 0 : i32
    %c0_i32_1 = arith.constant 0 : i32
    return %c0_i32, %c0_i32_0 : i32, i32
  }
  func.func @transform_5(%arg0: i32) -> (i32, i32) {
    %c0_i32 = arith.constant 0 : i32
    %c0_i32_0 = arith.constant 0 : i32
    return %arg0, %c0_i32 : i32, i32
  }
  func.func @transform_6(%arg0: i32) -> (i32, i32, i32) {
    %c0_i32 = arith.constant 0 : i32
    %c0_i32_0 = arith.constant 0 : i32
    %c0_i32_1 = arith.constant 0 : i32
    return %arg0, %c0_i32, %c0_i32_0 : i32, i32, i32
  }
}

</mosaic_0001>

<bundles_post_ra>
// kernel: tpu_custom_call.1
= control target key start
LH: loop header
LB: loop body
LE: loop exit
PB: predicated region body
PF: predicated region fallthrough
CT: control target
= control target key end

     0   :  { %12 = vsyncpa [#allocation3], 0  ;;  %s790_s0 = inlined_call_operand.vmem [shape: f32[64,32], index: 0, kind: input, shape index: {}]   ;;  %s791_s1 = inlined_call_operand.vmem [shape: f32[32,16], index: 1, kind: input, shape index: {}]   ;;  %s792_s2 = inlined_call_operand.vmem [shape: f32[1,16], index: 2, kind: input, shape index: {}]   ;;  %s793_s3 = inlined_call_operand.vmem [shape: f32[16,32], index: 3, kind: input, shape index: {}]   ;;  %s794_s4 = inlined_call_operand.vmem [shape: f32[1,32], index: 4, kind: input, shape index: {}]   ;;  %s795_s5 = inlined_call_operand.vmem [shape: f32[64,32], index: 5, kind: output, shape index: {0}]   ;;  %s796_s6 = inlined_call_operand.hbm [shape: f32[4,1,16], index: 6, kind: output, shape index: {1}]  }
   0x1   :  { %14 = vsyncpa [#allocation3 + $0x1], 0  ;;  %s664_s21 = smov 0   ;;  %s666_s22 = smov 0  }
   0x2   :  { %s668_s23 = smov 0   ;;  %s670_s24 = smov 0  }
   0x3 LB: > { %s685_s25 = sadd.s32 4294967295, %s627_s24   ;;  %s494_s26 = sadd.s32 4294967294, %s627_s24   ;;  %s627_s24 = sphi %s670_s24, %s802_s24   ;;  %s623_s23 = sphi %s668_s23, %s801_s23   ;;  %s619_s22 = sphi %s666_s22, %s800_s22   ;;  %s615_s21 = sphi %s664_s21, %s799_s21  }
   0x4   : > { %s689_s27 = sadd.s32 1, %s627_s24   ;;  %s163_s28 = sadd.s32 1, %s623_s23 }
   0x5   : > { %s160_s29 = ssub.s32 %s627_s24, %s689_s27  ;;  %p173_p0 = scmp.ne.s32.totalorder %s623_s23, %s619_s22 }
   0x6   : > { %p161_p1 = scmp.eq.s32.totalorder %s160_s29, 0  ;;  %p174_p2 = scmp.eq.s32.totalorder %s685_s25, 3 }
   0x7   : > { %p179_p3 = scmp.ne.s32.totalorder %s619_s22, %s615_s21  ;;  %p180_p4 = scmp.eq.s32.totalorder %s494_s26, 3 }
   0x8   : > { %s700_s30 = scalar_select %p161_p1, %s623_s23, %s163_s28  }
   0x9   : > { %p702_p5 = por %p174_p2, %p173_p0  ;;  %p706_p6 = por %p180_p4, %p179_p3 }
   0xa   : > { %p497_p7 = scmp.ge.s32.totalorder %s627_s24, 1  ;;  %p219_p8 = scmp.lt.s32.totalorder %s627_s24, 5 }
   0xc   : > { %p220_p9 = pnand %p497_p7, %p219_p8 }
   0xd   : > { %s498_s13 = sshll.u32 (!%p220_p9), %s685_s25, 1  ;;  %s251_s14 = sand.u32 (!%p220_p9), 1, %s619_s22  }
   0xe   : > { %223 = sbr.rel (%p220_p9) target bundleno = 324 (0x144), region = 40  ;;  %p254_p10 = scmp.lt.s32.totalorder (!%p220_p9), %s498_s13, 7 }
   0xf   : > { %s410_s17 = scalar_lea.hbm (!%p220_p9), %s796_s6, %s685_s25  ;;  %s252_s19 = scalar_lea.vmem (!%p220_p9), [#allocation2], %s251_s14 }
  0x10   : > { %s412_s20 = sshll.u32 (!%p220_p9), %s252_s19, 4  ;;  %s398_s28 = scalar_lea.sflag (!%p220_p9), [#allocation3], %s251_s14  ;;  %s413_s20 = int_to_ptr.vmem [resolvable:$true] %s412_s20 }
  0x11   : > { %s585_s11 = scalar_lea.hbm (!%p220_p9), %s796_s6, 4 }
  0x13   : > { %v270_v0 = vld [vmem:[%s791_s1 + $0x18] sm:$0xff]  ;;  %v269_v1 = vld [vmem:[%s791_s1 + $0x10] sm:$0xff]  ;;  %v268_v2 = vld [vmem:[%s791_s1 + $0x8] sm:$0xff]  ;;  %s804_s13 = smov (!%p254_p10, %s498_s13), 7  ;;  %vm275_vm0 = vcmask 261120   ;;  %vm349_vm4 = vcmask 130048  }
  0x14   : > { %294 = vmatpush.msra.mxu0 %v270_v0  ;;  %510 = vmatpush.msra.mxu2 %v270_v0  ;;  %v267_v3 = vld [vmem:[%s791_s1] sm:$0xff]  ;;  %s499_s18 = sshll.u32 %s804_s13, 3  ;;  %v344_v6 = vld [vmem:[%s793_s3 + $0x8] sm:$0xff]  ;;  %vm390_vm10 = vcmask 122880  }
  0x15   : > { %s257_s26 = scalar_lea.vmem %s790_s0, %s499_s18  ;;  %v343_v7 = vld [vmem:[%s793_s3] sm:$0xff]  ;;  %370 = vmatpush.msra.mxu1 %v344_v6  ;;  %514 = vmatpush.msra.mxu3 %v344_v6 }
  0x16   : > { %295 = vmatpush.msra.mxu0 %v269_v1  ;;  %511 = vmatpush.msra.mxu2 %v269_v1  ;;  %v265_v4 = vld [vmem:[%s257_s26] sm:$0xff]  ;;  %v266_v5 = vld [vmem:[%s257_s26 + $0x8] sm:$0xff]  ;;  %s414_s26 = sshll.u32 %s410_s17, 4  ;;  %s415_s26 = int_to_ptr.hbm [resolvable:$true] %s414_s26 }
  0x17   : > { %371 = vmatpush.msra.mxu1 %v343_v7  ;;  %515 = vmatpush.msra.mxu3 %v343_v7  ;;  %v555_v8 = vld [vmem:[%s792_s2] ss:$0 sm:$0xff]  ;;  %s579_s29 = sshra.s32 %s415_s26, 4  ;;  %s580_s29 = int_to_ptr.hbm [resolvable:$true] %s579_s29 }
  0x18   : > { %296 = vmatpush.msra.mxu0 %v268_v2  ;;  %512 = vmatpush.msra.mxu2 %v268_v2  ;;  %s581_s9 = scalar_lea.hbm %s580_s29, 1  ;;  %p586_p0 = scmp.lt.s32.totalorder %s580_s29, %s796_s6 }
  0x19   : > { %p582_p11 = scmp.ne.s32.totalorder %s580_s29, %s581_s9  ;;  %p587_p1 = scmp.lt.s32.totalorder %s585_s11, %s581_s9 }
  0x1a   : > { %297 = vmatpush.msra.mxu0 %v267_v3  ;;  %513 = vmatpush.msra.mxu2 %v267_v3 }
  0x1b   : > { %502 = vmatmul.msk.f32.vlgmr.msra.gmra.mxu0 %vm275_vm0, %v265_v4  ;;  %503 = vmatmul.msk.f32.vlgmr.msra.gmra.mxu2 %vm275_vm0, %v266_v5  ;;  %p583_p12 = pnand %p582_p11, %p702_p5  ;;  %p588_p2 = por %p587_p1, %p586_p0 }
  0x1d   : > { %p584_p13 = pneg %p583_p12 }
  0x1f   : > { %p589_p3 = pnand %p588_p2, %p584_p13 }
  0x98   : > { %v299_v9 = vpop.f32.mrf.mxu0 }
  0x99   : > { %v300_v10 = vadd.f32 %v555_v8, %v299_v9 }
  0x9b   : > { %v504_v11 = vmul.f32 -1.442695, %v300_v10 }
  0x9d   : > { %557 = vpow2.f32 %v504_v11 }
  0x9e   : > { %v302_v12 = vpop.f32.mrf.mxu2 }
  0x9f   : > { %v303_v13 = vadd.f32 %v555_v8, %v302_v12 }
  0xa1   : > { %v505_v14 = vmul.f32 -1.442695, %v303_v13 }
  0xa3   : > { %v558_v15 = vpop.eup %557  ;;  %559 = vpow2.f32 %v505_v14 }
  0xa4   : > { %v311_v16 = vadd.f32 1.0, %v558_v15 }
  0xa6   : > { %561 = vrcp.f32 %v311_v16  ;;  %v324_v21 = vand.u32 2147483648, %v311_v16  ;;  %vm318_vm1 = vweird.f32 %v311_v16  ;;  %v322_v24 = vand.u32 2147483647, %v311_v16 }
  0xa8   : > { %v325_v26 = vor.u32 1.1754944e-38, %v324_v21  ;;  %vm323_vm5 = vcmp.eq.f32.partialorder %v322_v24, 8.507059e+37 }
  0xa9   : > { %v560_v17 = vpop.eup %559 }
  0xaa   : > { %v312_v18 = vadd.f32 1.0, %v560_v17 }
  0xac   : > { %v562_v19 = vpop.eup %561  ;;  %563 = vrcp.f32 %v312_v18  ;;  %v339_v32 = vand.u32 2147483648, %v312_v18  ;;  %v337_v34 = vand.u32 2147483647, %v312_v18  ;;  %vm333_vm7 = vweird.f32 %v312_v18 }
  0xad   : > { %v314_v20 = vmul.f32 %v562_v19, %v311_v16  ;;  %vm319_vm2 = vweird.f32 %v562_v19 }
  0xae   : > { %vm320_vm3 = vmor %vm318_vm1, %vm319_vm2  ;;  %v340_v36 = vor.u32 1.1754944e-38, %v339_v32  ;;  %vm338_vm9 = vcmp.eq.f32.partialorder %v337_v34, 8.507059e+37 }
  0xaf   : > { %v315_v22 = vsub.f32 1.0, %v314_v20 }
  0xb1   : > { %v316_v23 = vmul.f32 %v562_v19, %v315_v22 }
  0xb2   : > { %v564_v25 = vpop.eup %563 }
  0xb3   : > { %v317_v27 = vadd.f32 %v562_v19, %v316_v23  ;;  %v329_v28 = vmul.f32 %v564_v25, %v312_v18  ;;  %vm334_vm6 = vweird.f32 %v564_v25 }
  0xb4   : > { %vm335_vm8 = vmor %vm333_vm7, %vm334_vm6 }
  0xb5   : > { %v321_v29 = vsel %vm320_vm3, %v562_v19, %v317_v27  ;;  %v330_v30 = vsub.f32 1.0, %v329_v28 }
  0xb6   : > { %v326_v31 = vsel %vm323_vm5, %v325_v26, %v321_v29 }
  0xb7   : > { %506 = vmatmul.msk.f32.vlgmr.msra.gmra.mxu1 %vm349_vm4, %v326_v31  ;;  %v331_v33 = vmul.f32 %v564_v25, %v330_v30  ;;  %v381_v39 = vsel %vm349_vm4, %v326_v31, 0.0 }
  0xb9   : > { %v332_v35 = vadd.f32 %v564_v25, %v331_v33 }
  0xbb   : > { %v336_v37 = vsel %vm335_vm8, %v564_v25, %v332_v35 }
  0xbc   : > { %v341_v38 = vsel %vm338_vm9, %v340_v36, %v336_v37 }
  0xbd   : > { %507 = vmatmul.msk.f32.vlgmr.msra.gmra.mxu3 %vm349_vm4, %v341_v38  ;;  %v382_v40 = vsel %vm349_vm4, %v341_v38, 0.0 }
  0xbe   : > { %v383_v41 = vadd.f32 %v382_v40, %v381_v39 }
  0xc0   : > { %v384_v42 = vrot.slane %v383_v41, 4 }
  0xc2   : > { %v385_v43 = vadd.f32 %v384_v42, %v383_v41 }
  0xc4   : > { %v386_v44 = vrot.slane %v385_v43, 2 }
  0xc6   : > { %v387_v45 = vadd.f32 %v386_v44, %v385_v43 }
  0xc8   : > { %v388_v46 = vrot.slane %v387_v45, 1 }
  0xca   : > { %v389_v47 = vadd.f32 %v388_v46, %v387_v45 }
  0xcc   : > { %391 = vst.msk [vmem:[%s252_s19] sm:$0x1] %vm390_vm10, %v389_v47 }
  0xcd   : > { %592 = shalt.err (!%p589_p3)
}
  0xce   : > { %516 = dma.vmem_to_hbm [thread:$0]  (%p702_p5), %s413_s20, 16, %s415_s26, %s398_s28   ;;  %v556_v48 = vld [vmem:[%s794_s4] ss:$0 sm:$0xff] }
  0xcf   : > { %s263_s25 = scalar_lea.vmem %s795_s5, %s499_s18 }
 0x134   : > { %v373_v49 = vpop.f32.mrf.mxu1 }
 0x135   : > { %v374_v50 = vadd.f32 %v556_v48, %v373_v49 }
 0x137   : > { %379 = vst.msk [vmem:[%s263_s25] sm:$0xff] %vm275_vm0, %v374_v50 }
 0x140   : > { %v376_v51 = vpop.f32.mrf.mxu3 }
 0x141   : > { %v377_v52 = vadd.f32 %v556_v48, %v376_v51 }
 0x143   : > { %380 = vst.msk [vmem:[%s263_s25 + $0x8] sm:$0xff] %vm275_vm0, %v377_v52 }
 0x144 PF: > { %p522_p4 = scmp.ge.s32.totalorder %s627_s24, 2  ;;  %s434_s7 = sand.u32 1, %s615_s21  }
 0x145   : > { %s435_s13 = scalar_lea.sflag [#allocation3], %s434_s7 }
 0x146   : > { %p519_p5 = pnand %p522_p4, %p706_p6 }
 0x148   : > { %p520_p7 = pneg %p519_p5 }
 0x14a   : > { %610 = dma.done.wait (%p520_p7), %s435_s13, 16  }
 0x14b   : > { %612 = vsyncadd (%p520_p7), %s435_s13, 4294967280  ;;  %p17_p8 = scmp.ge.s32.totalorder %s689_s27, 6   ;;  %s799_s21 = smov %s619_s22 }
 0x14c   : > { %s800_s22 = smov %s623_s23  ;;  %s801_s23 = smov %s700_s30 }
 0x14d   : > { %s802_s24 = smov %s689_s27  ;;  %19 = sbr.rel (!%p17_p8) target bundleno = 3 (0x3), region = 87 }
 0x152   :  { %440 = vsyncpa [#allocation3], 1 }
 0x153   :  { %442 = vsyncpa [#allocation3 + $0x1], 1 }

// kernel: tpu_custom_call.1
= control target key start
LH: loop header
LB: loop body
LE: loop exit
PB: predicated region body
PF: predicated region fallthrough
CT: control target
= control target key end

     0   :  { %12 = vsyncpa [#allocation3], 0  ;;  %s790_s0 = inlined_call_operand.vmem [shape: f32[64,32], index: 0, kind: input, shape index: {}]   ;;  %s791_s1 = inlined_call_operand.vmem [shape: f32[32,16], index: 1, kind: input, shape index: {}]   ;;  %s792_s2 = inlined_call_operand.vmem [shape: f32[1,16], index: 2, kind: input, shape index: {}]   ;;  %s793_s3 = inlined_call_operand.vmem [shape: f32[16,32], index: 3, kind: input, shape index: {}]   ;;  %s794_s4 = inlined_call_operand.vmem [shape: f32[1,32], index: 4, kind: input, shape index: {}]   ;;  %s795_s5 = inlined_call_operand.vmem [shape: f32[64,32], index: 5, kind: output, shape index: {0}]   ;;  %s796_s6 = inlined_call_operand.hbm [shape: f32[4,1,16], index: 6, kind: output, shape index: {1}]  }
   0x1   :  { %14 = vsyncpa [#allocation3 + $0x1], 0  ;;  %s664_s21 = smov 0   ;;  %s666_s22 = smov 0  }
   0x2   :  { %s668_s23 = smov 0   ;;  %s670_s24 = smov 0  }
   0x3 LB: > { %s685_s25 = sadd.s32 4294967295, %s627_s24   ;;  %s494_s26 = sadd.s32 4294967294, %s627_s24   ;;  %s627_s24 = sphi %s670_s24, %s802_s24   ;;  %s623_s23 = sphi %s668_s23, %s801_s23   ;;  %s619_s22 = sphi %s666_s22, %s800_s22   ;;  %s615_s21 = sphi %s664_s21, %s799_s21  }
   0x4   : > { %s689_s27 = sadd.s32 1, %s627_s24   ;;  %s163_s28 = sadd.s32 1, %s623_s23 }
   0x5   : > { %s160_s29 = ssub.s32 %s627_s24, %s689_s27  ;;  %p173_p0 = scmp.ne.s32.totalorder %s623_s23, %s619_s22 }
   0x6   : > { %p161_p1 = scmp.eq.s32.totalorder %s160_s29, 0  ;;  %p174_p2 = scmp.eq.s32.totalorder %s685_s25, 3 }
   0x7   : > { %p179_p3 = scmp.ne.s32.totalorder %s619_s22, %s615_s21  ;;  %p180_p4 = scmp.eq.s32.totalorder %s494_s26, 3 }
   0x8   : > { %s700_s30 = scalar_select %p161_p1, %s623_s23, %s163_s28  }
   0x9   : > { %p702_p5 = por %p174_p2, %p173_p0  ;;  %p706_p6 = por %p180_p4, %p179_p3 }
   0xa   : > { %p497_p7 = scmp.ge.s32.totalorder %s627_s24, 1  ;;  %p219_p8 = scmp.lt.s32.totalorder %s627_s24, 5 }
   0xc   : > { %p220_p9 = pnand %p497_p7, %p219_p8 }
   0xd   : > { %s498_s13 = sshll.u32 (!%p220_p9), %s685_s25, 1  ;;  %s251_s14 = sand.u32 (!%p220_p9), 1, %s619_s22  }
   0xe   : > { %223 = sbr.rel (%p220_p9) target bundleno = 324 (0x144), region = 40  ;;  %p254_p10 = scmp.lt.s32.totalorder (!%p220_p9), %s498_s13, 7 }
   0xf   : > { %s410_s17 = scalar_lea.hbm (!%p220_p9), %s796_s6, %s685_s25  ;;  %s252_s19 = scalar_lea.vmem (!%p220_p9), [#allocation2], %s251_s14 }
  0x10   : > { %s412_s20 = sshll.u32 (!%p220_p9), %s252_s19, 4  ;;  %s398_s28 = scalar_lea.sflag (!%p220_p9), [#allocation3], %s251_s14  ;;  %s413_s20 = int_to_ptr.vmem [resolvable:$true] %s412_s20 }
  0x11   : > { %s585_s11 = scalar_lea.hbm (!%p220_p9), %s796_s6, 4 }
  0x13   : > { %v270_v0 = vld [vmem:[%s791_s1 + $0x18] sm:$0xff]  ;;  %v269_v1 = vld [vmem:[%s791_s1 + $0x10] sm:$0xff]  ;;  %v268_v2 = vld [vmem:[%s791_s1 + $0x8] sm:$0xff]  ;;  %s804_s13 = smov (!%p254_p10, %s498_s13), 7  ;;  %vm275_vm0 = vcmask 261120   ;;  %vm349_vm4 = vcmask 130048  }
  0x14   : > { %294 = vmatpush.msra.mxu0 %v270_v0  ;;  %510 = vmatpush.msra.mxu2 %v270_v0  ;;  %v267_v3 = vld [vmem:[%s791_s1] sm:$0xff]  ;;  %s499_s18 = sshll.u32 %s804_s13, 3  ;;  %v344_v6 = vld [vmem:[%s793_s3 + $0x8] sm:$0xff]  ;;  %vm390_vm10 = vcmask 122880  }
  0x15   : > { %s257_s26 = scalar_lea.vmem %s790_s0, %s499_s18  ;;  %v343_v7 = vld [vmem:[%s793_s3] sm:$0xff]  ;;  %370 = vmatpush.msra.mxu1 %v344_v6  ;;  %514 = vmatpush.msra.mxu3 %v344_v6 }
  0x16   : > { %295 = vmatpush.msra.mxu0 %v269_v1  ;;  %511 = vmatpush.msra.mxu2 %v269_v1  ;;  %v265_v4 = vld [vmem:[%s257_s26] sm:$0xff]  ;;  %v266_v5 = vld [vmem:[%s257_s26 + $0x8] sm:$0xff]  ;;  %s414_s26 = sshll.u32 %s410_s17, 4  ;;  %s415_s26 = int_to_ptr.hbm [resolvable:$true] %s414_s26 }
  0x17   : > { %371 = vmatpush.msra.mxu1 %v343_v7  ;;  %515 = vmatpush.msra.mxu3 %v343_v7  ;;  %v555_v8 = vld [vmem:[%s792_s2] ss:$0 sm:$0xff]  ;;  %s579_s29 = sshra.s32 %s415_s26, 4  ;;  %s580_s29 = int_to_ptr.hbm [resolvable:$true] %s579_s29 }
  0x18   : > { %296 = vmatpush.msra.mxu0 %v268_v2  ;;  %512 = vmatpush.msra.mxu2 %v268_v2  ;;  %s581_s9 = scalar_lea.hbm %s580_s29, 1  ;;  %p586_p0 = scmp.lt.s32.totalorder %s580_s29, %s796_s6 }
  0x19   : > { %p582_p11 = scmp.ne.s32.totalorder %s580_s29, %s581_s9  ;;  %p587_p1 = scmp.lt.s32.totalorder %s585_s11, %s581_s9 }
  0x1a   : > { %297 = vmatpush.msra.mxu0 %v267_v3  ;;  %513 = vmatpush.msra.mxu2 %v267_v3 }
  0x1b   : > { %502 = vmatmul.msk.f32.vlgmr.msra.gmra.mxu0 %vm275_vm0, %v265_v4  ;;  %503 = vmatmul.msk.f32.vlgmr.msra.gmra.mxu2 %vm275_vm0, %v266_v5  ;;  %p583_p12 = pnand %p582_p11, %p702_p5  ;;  %p588_p2 = por %p587_p1, %p586_p0 }
  0x1d   : > { %p584_p13 = pneg %p583_p12 }
  0x1f   : > { %p589_p3 = pnand %p588_p2, %p584_p13 }
  0x98   : > { %v299_v9 = vpop.f32.mrf.mxu0 }
  0x99   : > { %v300_v10 = vadd.f32 %v555_v8, %v299_v9 }
  0x9b   : > { %v504_v11 = vmul.f32 -1.442695, %v300_v10 }
  0x9d   : > { %557 = vpow2.f32 %v504_v11 }
  0x9e   : > { %v302_v12 = vpop.f32.mrf.mxu2 }
  0x9f   : > { %v303_v13 = vadd.f32 %v555_v8, %v302_v12 }
  0xa1   : > { %v505_v14 = vmul.f32 -1.442695, %v303_v13 }
  0xa3   : > { %v558_v15 = vpop.eup %557  ;;  %559 = vpow2.f32 %v505_v14 }
  0xa4   : > { %v311_v16 = vadd.f32 1.0, %v558_v15 }
  0xa6   : > { %561 = vrcp.f32 %v311_v16  ;;  %v324_v21 = vand.u32 2147483648, %v311_v16  ;;  %vm318_vm1 = vweird.f32 %v311_v16  ;;  %v322_v24 = vand.u32 2147483647, %v311_v16 }
  0xa8   : > { %v325_v26 = vor.u32 1.1754944e-38, %v324_v21  ;;  %vm323_vm5 = vcmp.eq.f32.partialorder %v322_v24, 8.507059e+37 }
  0xa9   : > { %v560_v17 = vpop.eup %559 }
  0xaa   : > { %v312_v18 = vadd.f32 1.0, %v560_v17 }
  0xac   : > { %v562_v19 = vpop.eup %561  ;;  %563 = vrcp.f32 %v312_v18  ;;  %v339_v32 = vand.u32 2147483648, %v312_v18  ;;  %v337_v34 = vand.u32 2147483647, %v312_v18  ;;  %vm333_vm7 = vweird.f32 %v312_v18 }
  0xad   : > { %v314_v20 = vmul.f32 %v562_v19, %v311_v16  ;;  %vm319_vm2 = vweird.f32 %v562_v19 }
  0xae   : > { %vm320_vm3 = vmor %vm318_vm1, %vm319_vm2  ;;  %v340_v36 = vor.u32 1.1754944e-38, %v339_v32  ;;  %vm338_vm9 = vcmp.eq.f32.partialorder %v337_v34, 8.507059e+37 }
  0xaf   : > { %v315_v22 = vsub.f32 1.0, %v314_v20 }
  0xb1   : > { %v316_v23 = vmul.f32 %v562_v19, %v315_v22 }
  0xb2   : > { %v564_v25 = vpop.eup %563 }
  0xb3   : > { %v317_v27 = vadd.f32 %v562_v19, %v316_v23  ;;  %v329_v28 = vmul.f32 %v564_v25, %v312_v18  ;;  %vm334_vm6 = vweird.f32 %v564_v25 }
  0xb4   : > { %vm335_vm8 = vmor %vm333_vm7, %vm334_vm6 }
  0xb5   : > { %v321_v29 = vsel %vm320_vm3, %v562_v19, %v317_v27  ;;  %v330_v30 = vsub.f32 1.0, %v329_v28 }
  0xb6   : > { %v326_v31 = vsel %vm323_vm5, %v325_v26, %v321_v29 }
  0xb7   : > { %506 = vmatmul.msk.f32.vlgmr.msra.gmra.mxu1 %vm349_vm4, %v326_v31  ;;  %v331_v33 = vmul.f32 %v564_v25, %v330_v30  ;;  %v381_v39 = vsel %vm349_vm4, %v326_v31, 0.0 }
  0xb9   : > { %v332_v35 = vadd.f32 %v564_v25, %v331_v33 }
  0xbb   : > { %v336_v37 = vsel %vm335_vm8, %v564_v25, %v332_v35 }
  0xbc   : > { %v341_v38 = vsel %vm338_vm9, %v340_v36, %v336_v37 }
  0xbd   : > { %507 = vmatmul.msk.f32.vlgmr.msra.gmra.mxu3 %vm349_vm4, %v341_v38  ;;  %v382_v40 = vsel %vm349_vm4, %v341_v38, 0.0 }
  0xbe   : > { %v383_v41 = vadd.f32 %v382_v40, %v381_v39 }
  0xc0   : > { %v384_v42 = vrot.slane %v383_v41, 4 }
  0xc2   : > { %v385_v43 = vadd.f32 %v384_v42, %v383_v41 }
  0xc4   : > { %v386_v44 = vrot.slane %v385_v43, 2 }
  0xc6   : > { %v387_v45 = vadd.f32 %v386_v44, %v385_v43 }
  0xc8   : > { %v388_v46 = vrot.slane %v387_v45, 1 }
  0xca   : > { %v389_v47 = vadd.f32 %v388_v46, %v387_v45 }
  0xcc   : > { %391 = vst.msk [vmem:[%s252_s19] sm:$0x1] %vm390_vm10, %v389_v47 }
  0xcd   : > { %592 = shalt.err (!%p589_p3)
}
  0xce   : > { %516 = dma.vmem_to_hbm [thread:$0]  (%p702_p5), %s413_s20, 16, %s415_s26, %s398_s28   ;;  %v556_v48 = vld [vmem:[%s794_s4] ss:$0 sm:$0xff] }
  0xcf   : > { %s263_s25 = scalar_lea.vmem %s795_s5, %s499_s18 }
 0x134   : > { %v373_v49 = vpop.f32.mrf.mxu1 }
 0x135   : > { %v374_v50 = vadd.f32 %v556_v48, %v373_v49 }
 0x137   : > { %379 = vst.msk [vmem:[%s263_s25] sm:$0xff] %vm275_vm0, %v374_v50 }
 0x140   : > { %v376_v51 = vpop.f32.mrf.mxu3 }
 0x141   : > { %v377_v52 = vadd.f32 %v556_v48, %v376_v51 }
 0x143   : > { %380 = vst.msk [vmem:[%s263_s25 + $0x8] sm:$0xff] %vm275_vm0, %v377_v52 }
 0x144 PF: > { %p522_p4 = scmp.ge.s32.totalorder %s627_s24, 2  ;;  %s434_s7 = sand.u32 1, %s615_s21  }
 0x145   : > { %s435_s13 = scalar_lea.sflag [#allocation3], %s434_s7 }
 0x146   : > { %p519_p5 = pnand %p522_p4, %p706_p6 }
 0x148   : > { %p520_p7 = pneg %p519_p5 }
 0x14a   : > { %610 = dma.done.wait (%p520_p7), %s435_s13, 16  }
 0x14b   : > { %612 = vsyncadd (%p520_p7), %s435_s13, 4294967280  ;;  %p17_p8 = scmp.ge.s32.totalorder %s689_s27, 6   ;;  %s799_s21 = smov %s619_s22 }
 0x14c   : > { %s800_s22 = smov %s623_s23  ;;  %s801_s23 = smov %s700_s30 }
 0x14d   : > { %s802_s24 = smov %s689_s27  ;;  %19 = sbr.rel (!%p17_p8) target bundleno = 3 (0x3), region = 87 }
 0x152   :  { %440 = vsyncpa [#allocation3], 1 }
 0x153   :  { %442 = vsyncpa [#allocation3 + $0x1], 1 }

</bundles_post_ra>
